<compile_context>
chip_gen: v7x
topology: tpu7x:2x2x1
jax: 0.10.0
libtpu: 0.0.40
codegen_flags: <defaults>
</compile_context>

<pallas_src>
import math

import jax
import jax.numpy as jnp
from jax.experimental import pallas as pl
from jax.experimental.pallas import tpu as pltpu

LOG_2PI = math.log(2.0 * math.pi)
HID = 64            # per-branch hidden width (nn.Linear(*, 64))
FUSED_HID = 128     # actor|critic hidden concatenated -> one MXU-filling dim
LANES = 128         # TPU lane width; batch lives on the lane axis in-kernel


def _cdiv(a, b):
    return (a + b - 1) // b


def _round_up(x, m):
    return _cdiv(x, m) * m


# --------------------------------------------------------------------------
# Kernel: one batch tile (TB lanes) per grid step, batch-in-lanes layout.
# --------------------------------------------------------------------------
def _actor_critic_kernel(x_ref, a_ref,
                         w1_ref, b1_ref, w2_ref, b2_ref, w3_ref, b3_ref,
                         inv2var_ref, lpconst_ref, out_ref):
    x = x_ref[...]                                             # (S, TB) compute dtype

    # Fused actor+critic MLP; f32 MXU accumulation, f32 tanh on the EUP.
    h = jnp.tanh(jnp.dot(w1_ref[...], x,
                         preferred_element_type=jnp.float32) + b1_ref[...])
    h = h.astype(w2_ref.dtype)
    h = jnp.tanh(jnp.dot(w2_ref[...], h,
                         preferred_element_type=jnp.float32) + b2_ref[...])
    h = h.astype(w3_ref.dtype)
    head = jnp.dot(w3_ref[...], h,
                   preferred_element_type=jnp.float32) + b3_ref[...]  # (OUT_ROWS, TB)

    A = a_ref.shape[0]
    mean = head[:A, :]                                         # (A, TB)
    value = head[A:A + 1, :]                                   # (1, TB)

    # Normal log-prob, divide- and exp-free (inv_2var / constants precomputed).
    diff = a_ref[...] - mean                                   # (A, TB) f32
    lp = diff * diff * inv2var_ref[...] + lpconst_ref[...]     # (A, TB)
    logp = -jnp.sum(lp, axis=0, keepdims=True)                 # (1, TB)

    # Packed, lane-dense writeback: row 0 = logp, row 1 = value.
    out_ref[...] = jnp.concatenate([logp, value], axis=0)      # (2, TB)


# --------------------------------------------------------------------------
# Parameter fusion (plain JAX, outside the kernel).
# --------------------------------------------------------------------------
def _fuse_params(params, compute_dtype):
    A = params["aw3"].shape[1]
    assert params["aw1"].shape[1] == HID and params["cw1"].shape[1] == HID, \
        "fusion assumes 64-wide hidden layers"
    assert A >= 1
    out_rows = _round_up(A + 1, 8)   # actor rows 0..A-1, critic row A, zero pad

    # layer 1: x(S) -> [actor_h | critic_h] (128)
    w1 = jnp.concatenate([params["aw1"], params["cw1"]], axis=1)      # (S, 128)
    b1 = jnp.concatenate([params["ab1"], params["cb1"]], axis=1)      # (1, 128)

    # layer 2: block-diagonal (actor / critic stay independent)
    w2 = jnp.zeros((FUSED_HID, FUSED_HID), jnp.float32)
    w2 = w2.at[:HID, :HID].set(params["aw2"]).at[HID:, HID:].set(params["cw2"])
    b2 = jnp.concatenate([params["ab2"], params["cb2"]], axis=1)      # (1, 128)

    # layer 3: columns 0..A-1 actor mean head, column A critic value head
    w3 = jnp.zeros((FUSED_HID, out_rows), jnp.float32)
    w3 = w3.at[:HID, :A].set(params["aw3"]).at[HID:, A].set(params["cw3"][:, 0])
    b3 = jnp.zeros((1, out_rows), jnp.float32)
    b3 = b3.at[:, :A].set(params["ab3"]).at[:, A].set(params["cb3"][0, 0])

    # logstd-derived constants hoisted out of the kernel (state independent).
    logstd = params["logstd"].astype(jnp.float32)                      # (1, A)
    inv_2var = (0.5 * jnp.exp(-2.0 * logstd)).T                        # (A, 1)
    lp_const = (logstd + 0.5 * jnp.float32(LOG_2PI)).T                 # (A, 1)

    # Transposed (batch-in-lanes) weights; biases as f32 columns.
    return (w1.T.astype(compute_dtype), b1.T.astype(jnp.float32),      # (128,S),(128,1)
            w2.T.astype(compute_dtype), b2.T.astype(jnp.float32),      # (128,128),(128,1)
            w3.T.astype(compute_dtype), b3.T.astype(jnp.float32),      # (OUT_ROWS,128),(OUT_ROWS,1)
            inv_2var, lp_const)


# --------------------------------------------------------------------------
# Batch tiling: batch is the lane axis -> TB multiple of 128; keep grid >= 2
# when there is enough work (v7x dual TensorCore) and padding waste small.
# --------------------------------------------------------------------------
def _choose_tiling(B, max_tb):
    nblk = _cdiv(max(B, 1), LANES)                 # 128-row lane groups
    max_blk = max(1, min(max_tb // LANES, nblk))
    if nblk >= 2:                                  # prefer >= 2 grid steps
        max_blk = min(max_blk, _cdiv(nblk, 2))
    grid_n = _cdiv(nblk, max_blk)
    blk = _cdiv(nblk, grid_n)                      # balanced tiles -> waste < TB
    TB = blk * LANES
    return TB, TB * grid_n, grid_n


# --------------------------------------------------------------------------
# Wrapper.
# --------------------------------------------------------------------------
def actor_critic_evaluate(state, action, params, *,
                          compute_dtype=jnp.bfloat16, max_tb=8192):
    """Returns (action_logprobs [B], state_values [B,1], dist_entropy [B])."""
    B, S = state.shape
    A = action.shape[1]

    (w1t, b1c, w2t, b2c, w3t, b3c, inv2var, lpconst) = _fuse_params(params,
                                                                    compute_dtype)
    out_rows = w3t.shape[0]

    TB, Bp, grid_n = _choose_tiling(B, max_tb)

    # Batch-in-lanes inputs (cheap XLA transposes of tiny per-row data).
    xs = state.astype(compute_dtype).T             # (S, B)
    at = action.astype(jnp.float32).T              # (A, B) -- f32 epilogue (v5e)
    if Bp != B:
        xs = jnp.pad(xs, ((0, 0), (0, Bp - B)))
        at = jnp.pad(at, ((0, 0), (0, Bp - B)))

    flops = 2 * Bp * (S * FUSED_HID + FUSED_HID * FUSED_HID + FUSED_HID * out_rows)
    transcendentals = Bp * 2 * FUSED_HID           # tanh only (exp hoisted out)
    bytes_accessed = (xs.size * xs.dtype.itemsize + at.size * 4
                      + Bp * 2 * 4                 # packed (2, Bp) f32 output
                      + sum(int(t.size) * t.dtype.itemsize
                            for t in (w1t, b1c, w2t, b2c, w3t, b3c,
                                      inv2var, lpconst)))

    out = pl.pallas_call(
        _actor_critic_kernel,
        out_shape=jax.ShapeDtypeStruct((2, Bp), jnp.float32),
        grid=(grid_n,),
        in_specs=[
            pl.BlockSpec((S, TB), lambda i: (0, i)),        # state tile (lanes=batch)
            pl.BlockSpec((A, TB), lambda i: (0, i)),        # action tile
            pl.BlockSpec(w1t.shape, lambda i: (0, 0)),      # resident fused weights
            pl.BlockSpec(b1c.shape, lambda i: (0, 0)),
            pl.BlockSpec(w2t.shape, lambda i: (0, 0)),
            pl.BlockSpec(b2c.shape, lambda i: (0, 0)),
            pl.BlockSpec(w3t.shape, lambda i: (0, 0)),
            pl.BlockSpec(b3c.shape, lambda i: (0, 0)),
            pl.BlockSpec(inv2var.shape, lambda i: (0, 0)),
            pl.BlockSpec(lpconst.shape, lambda i: (0, 0)),
        ],
        out_specs=pl.BlockSpec((2, TB), lambda i: (0, i)),
        compiler_params=pltpu.CompilerParams(
            dimension_semantics=("parallel",)),
        cost_estimate=pl.CostEstimate(flops=int(flops),
                                      transcendentals=int(transcendentals),
                                      bytes_accessed=int(bytes_accessed)),
    )(xs, at, w1t, b1c, w2t, b2c, w3t, b3c, inv2var, lpconst)

    # Padded batch rows live in lanes >= B of the last tile; sliced away here.
    logp = out[0, :B]
    value = out[1, :B].reshape(B, 1)

    # Entropy depends only on logstd -> computed on the host side of the call.
    ent_scalar = jnp.sum(0.5 + 0.5 * LOG_2PI + params["logstd"].astype(jnp.float32))
    ent = jnp.broadcast_to(ent_scalar, (B,))
    return logp, value, ent


# --------------------------------------------------------------------------
# Deterministic synthetic parameters (shapes match the nn.Linear layers).
# --------------------------------------------------------------------------
def init_params(state_dim, action_dim, key):
    ks = jax.random.split(key, 6)

    def lin(k, fan_in, fan_out):
        bound = 1.0 / math.sqrt(fan_in)
        kw, kb = jax.random.split(k)
        w = jax.random.uniform(kw, (fan_in, fan_out), jnp.float32, -bound, bound)
        b = jax.random.uniform(kb, (1, fan_out), jnp.float32, -bound, bound)
        return w, b

    aw1, ab1 = lin(ks[0], state_dim, HID)
    aw2, ab2 = lin(ks[1], HID, HID)
    aw3, ab3 = lin(ks[2], HID, action_dim)
    cw1, cb1 = lin(ks[3], state_dim, HID)
    cw2, cb2 = lin(ks[4], HID, HID)
    cw3, cb3 = lin(ks[5], HID, 1)
    logstd = jnp.zeros((1, action_dim), jnp.float32)

    return dict(aw1=aw1, ab1=ab1, aw2=aw2, ab2=ab2, aw3=aw3, ab3=ab3,
                logstd=logstd,
                cw1=cw1, cb1=cb1, cw2=cw2, cb2=cb2, cw3=cw3, cb3=cb3)


# --------------------------------------------------------------------------
# Pure-JAX reference (un-fused branches) for sanity checking.
# --------------------------------------------------------------------------
def _reference(state, action, p, compute_dtype=jnp.float32):
    cd = compute_dtype

    def dot(a, b):
        return jnp.dot(a.astype(cd), b.astype(cd),
                       preferred_element_type=jnp.float32)

    h = jnp.tanh(dot(state, p["aw1"]) + p["ab1"]).astype(jnp.float32)
    h = jnp.tanh(dot(h, p["aw2"]) + p["ab2"]).astype(jnp.float32)
    mean = dot(h, p["aw3"]) + p["ab3"]

    logstd = p["logstd"].astype(jnp.float32)
    inv_2var = 0.5 * jnp.exp(-2.0 * logstd)
    diff = action - mean
    logp = jnp.sum(-(diff * diff) * inv_2var - logstd - 0.5 * LOG_2PI, axis=-1)
    ent = jnp.broadcast_to(jnp.sum(0.5 + 0.5 * LOG_2PI + logstd),
                           (state.shape[0],))

    hc = jnp.tanh(dot(state, p["cw1"]) + p["cb1"]).astype(jnp.float32)
    hc = jnp.tanh(dot(hc, p["cw2"]) + p["cb2"]).astype(jnp.float32)
    value = dot(hc, p["cw3"]) + p["cb3"]
    return logp, value, ent


if __name__ == "__main__":
    B, STATE_DIM, ACTION_DIM = 8, 16, 4

    key = jax.random.PRNGKey(0)
    k_state, k_action, k_params = jax.random.split(key, 3)

    state = jax.random.normal(k_state, (B, STATE_DIM), jnp.float32)
    action = jax.random.normal(k_action, (B, ACTION_DIM), jnp.float32)
    params = init_params(STATE_DIM, ACTION_DIM, k_params)

    r_lp, r_v, r_e = _reference(state, action, params, jnp.float32)

    # --- f32 compute path: strict correctness check -------------------------
    lp32, v32, e32 = actor_critic_evaluate(state, action, params,
                                           compute_dtype=jnp.float32)
    jax.block_until_ready((lp32, v32, e32))
    assert lp32.shape == (B,) and v32.shape == (B, 1) and e32.shape == (B,)
    assert jnp.allclose(lp32, r_lp, atol=5e-2, rtol=5e-2), "f32 logprob mismatch"
    assert jnp.allclose(v32, r_v, atol=5e-2, rtol=5e-2), "f32 value mismatch"
    assert jnp.allclose(e32, r_e, atol=1e-5), "entropy mismatch"

    # --- bf16 compute path (default / perf path) ----------------------------
    logp, value, ent = actor_critic_evaluate(state, action, params)
    jax.block_until_ready((logp, value, ent))
    assert bool(jnp.all(jnp.isfinite(logp))) and bool(jnp.all(jnp.isfinite(value)))

    # Matched-precision (bf16 matmul inputs, f32 accum) reference check.
    rb_lp, rb_v, rb_e = _reference(state, action, params, jnp.bfloat16)
    assert jnp.allclose(logp, rb_lp, atol=3e-2, rtol=3e-2), "bf16 logprob mismatch"
    assert jnp.allclose(value, rb_v, atol=3e-2, rtol=3e-2), "bf16 value mismatch"
    assert jnp.allclose(ent, rb_e, atol=1e-5), "bf16 entropy mismatch"

    # Loose check vs. the full-f32 reference (bf16 rounding budget).
    assert jnp.allclose(logp, r_lp, atol=0.3), "bf16 vs f32 logprob drifted"
    assert jnp.allclose(value, r_v, atol=0.3), "bf16 vs f32 value drifted"

    print("KERNEL_OK")
</pallas_src>

<mosaic_0001>
module attributes {stable_mosaic.version = 11 : i64} {
  func.func @_actor_critic_kernel(%arg0: i32, %arg1: memref<16x128xf32, #tpu.memory_space<vmem>>, %arg2: memref<4x128xf32, #tpu.memory_space<vmem>>, %arg3: memref<128x16xf32, #tpu.memory_space<vmem>>, %arg4: memref<128x1xf32, #tpu.memory_space<vmem>>, %arg5: memref<128x128xf32, #tpu.memory_space<vmem>>, %arg6: memref<128x1xf32, #tpu.memory_space<vmem>>, %arg7: memref<8x128xf32, #tpu.memory_space<vmem>>, %arg8: memref<8x1xf32, #tpu.memory_space<vmem>>, %arg9: memref<4x1xf32, #tpu.memory_space<vmem>>, %arg10: memref<4x1xf32, #tpu.memory_space<vmem>>, %arg11: memref<2x128xf32, #tpu.memory_space<vmem>>) attributes {dimension_semantics = [#tpu.dimension_semantics<parallel>], iteration_bounds = array<i64: 1>, scalar_prefetch = 0 : i64, scratch_operands = 0 : i64, tpu.core_type = #tpu.core_type<tc>, window_params = [{transform_indices = @transform_0, window_bounds = array<i64: 16, 128>}, {transform_indices = @transform_1, window_bounds = array<i64: 4, 128>}, {pipeline_mode = #tpu.pipeline_mode<synchronous>, transform_indices = @transform_2, window_bounds = array<i64: 128, 16>}, {pipeline_mode = #tpu.pipeline_mode<synchronous>, transform_indices = @transform_3, window_bounds = array<i64: 128, 1>}, {pipeline_mode = #tpu.pipeline_mode<synchronous>, transform_indices = @transform_4, window_bounds = array<i64: 128, 128>}, {pipeline_mode = #tpu.pipeline_mode<synchronous>, transform_indices = @transform_5, window_bounds = array<i64: 128, 1>}, {pipeline_mode = #tpu.pipeline_mode<synchronous>, transform_indices = @transform_6, window_bounds = array<i64: 8, 128>}, {pipeline_mode = #tpu.pipeline_mode<synchronous>, transform_indices = @transform_7, window_bounds = array<i64: 8, 1>}, {pipeline_mode = #tpu.pipeline_mode<synchronous>, transform_indices = @transform_8, window_bounds = array<i64: 4, 1>}, {pipeline_mode = #tpu.pipeline_mode<synchronous>, transform_indices = @transform_9, window_bounds = array<i64: 4, 1>}, {transform_indices = @transform_10, window_bounds = array<i64: 2, 128>}]} {
    %c0 = arith.constant 0 : index
    %c0_0 = arith.constant 0 : index
    %0 = vector.load %arg1[%c0, %c0_0] : memref<16x128xf32, #tpu.memory_space<vmem>>, vector<16x128xf32>
    %c0_1 = arith.constant 0 : index
    %c0_2 = arith.constant 0 : index
    %1 = vector.load %arg3[%c0_1, %c0_2] : memref<128x16xf32, #tpu.memory_space<vmem>>, vector<128x16xf32>
    %cst = arith.constant dense<0.000000e+00> : vector<128x128xf32>
    %2 = tpu.matmul %1, %0, %cst {dimension_numbers = #tpu.dot_dimension_numbers<[1], [0], [0], [1], [0, 0, 1, 1], [], []>} : vector<128x16xf32>, vector<16x128xf32>, vector<128x128xf32> -> vector<128x128xf32>
    %c0_3 = arith.constant 0 : index
    %c0_4 = arith.constant 0 : index
    %3 = vector.load %arg4[%c0_3, %c0_4] : memref<128x1xf32, #tpu.memory_space<vmem>>, vector<128x1xf32>
    %4 = vector.broadcast %3 : vector<128x1xf32> to vector<128x128xf32>
    %5 = arith.addf %2, %4 : vector<128x128xf32>
    %6 = math.tanh %5 : vector<128x128xf32>
    %c0_5 = arith.constant 0 : index
    %c0_6 = arith.constant 0 : index
    %7 = vector.load %arg5[%c0_5, %c0_6] : memref<128x128xf32, #tpu.memory_space<vmem>>, vector<128x128xf32>
    %cst_7 = arith.constant dense<0.000000e+00> : vector<128x128xf32>
    %8 = tpu.matmul %7, %6, %cst_7 {dimension_numbers = #tpu.dot_dimension_numbers<[1], [0], [0], [1], [0, 0, 1, 1], [], []>} : vector<128x128xf32>, vector<128x128xf32>, vector<128x128xf32> -> vector<128x128xf32>
    %c0_8 = arith.constant 0 : index
    %c0_9 = arith.constant 0 : index
    %9 = vector.load %arg6[%c0_8, %c0_9] : memref<128x1xf32, #tpu.memory_space<vmem>>, vector<128x1xf32>
    %10 = vector.broadcast %9 : vector<128x1xf32> to vector<128x128xf32>
    %11 = arith.addf %8, %10 : vector<128x128xf32>
    %12 = math.tanh %11 : vector<128x128xf32>
    %c0_10 = arith.constant 0 : index
    %c0_11 = arith.constant 0 : index
    %13 = vector.load %arg7[%c0_10, %c0_11] : memref<8x128xf32, #tpu.memory_space<vmem>>, vector<8x128xf32>
    %cst_12 = arith.constant dense<0.000000e+00> : vector<8x128xf32>
    %14 = tpu.matmul %13, %12, %cst_12 {dimension_numbers = #tpu.dot_dimension_numbers<[1], [0], [0], [1], [0, 0, 1, 1], [], []>} : vector<8x128xf32>, vector<128x128xf32>, vector<8x128xf32> -> vector<8x128xf32>
    %c0_13 = arith.constant 0 : index
    %c0_14 = arith.constant 0 : index
    %15 = vector.load %arg8[%c0_13, %c0_14] : memref<8x1xf32, #tpu.memory_space<vmem>>, vector<8x1xf32>
    %16 = vector.broadcast %15 : vector<8x1xf32> to vector<8x128xf32>
    %17 = arith.addf %14, %16 : vector<8x128xf32>
    %18 = vector.extract_strided_slice %17 {offsets = [0, 0], sizes = [4, 128], strides = [1, 1]} : vector<8x128xf32> to vector<4x128xf32>
    %19 = vector.extract_strided_slice %17 {offsets = [4, 0], sizes = [1, 128], strides = [1, 1]} : vector<8x128xf32> to vector<1x128xf32>
    %c0_15 = arith.constant 0 : index
    %c0_16 = arith.constant 0 : index
    %20 = vector.load %arg2[%c0_15, %c0_16] : memref<4x128xf32, #tpu.memory_space<vmem>>, vector<4x128xf32>
    %21 = arith.subf %20, %18 : vector<4x128xf32>
    %22 = arith.mulf %21, %21 : vector<4x128xf32>
    %c0_17 = arith.constant 0 : index
    %c0_18 = arith.constant 0 : index
    %23 = vector.load %arg9[%c0_17, %c0_18] : memref<4x1xf32, #tpu.memory_space<vmem>>, vector<4x1xf32>
    %24 = vector.broadcast %23 : vector<4x1xf32> to vector<4x128xf32>
    %25 = arith.mulf %22, %24 : vector<4x128xf32>
    %c0_19 = arith.constant 0 : index
    %c0_20 = arith.constant 0 : index
    %26 = vector.load %arg10[%c0_19, %c0_20] : memref<4x1xf32, #tpu.memory_space<vmem>>, vector<4x1xf32>
    %27 = vector.broadcast %26 : vector<4x1xf32> to vector<4x128xf32>
    %28 = arith.addf %25, %27 : vector<4x128xf32>
    %cst_21 = arith.constant dense<0.000000e+00> : vector<128xf32>
    %29 = vector.multi_reduction <add>, %28, %cst_21 [0] : vector<4x128xf32> to vector<128xf32>
    %30 = vector.shape_cast %29 : vector<128xf32> to vector<1x128xf32>
    %cst_22 = arith.constant 0.000000e+00 : f32
    %31 = vector.broadcast %cst_22 : f32 to vector<1x128xf32>
    %32 = arith.subf %31, %30 : vector<1x128xf32>
    %33 = tpu.concatenate %32, %19 in 0 : vector<1x128xf32>, vector<1x128xf32> -> vector<2x128xf32>
    %c0_23 = arith.constant 0 : index
    %c0_24 = arith.constant 0 : index
    %34 = vector.load %arg11[%c0_23, %c0_24] : memref<2x128xf32, #tpu.memory_space<vmem>>, vector<2x128xf32>
    tpu.vector_store %arg11[%c0_23, %c0_24], %33 {strides = array<i32>} : memref<2x128xf32, #tpu.memory_space<vmem>>, vector<2x128xf32>,
    return
  }
  func.func @transform_0(%arg0: i32) -> (i32, i32) {
    %c0_i32 = arith.constant 0 : i32
    %c0_i32_0 = arith.constant 0 : i32
    return %c0_i32, %arg0 : i32, i32
  }
  func.func @transform_1(%arg0: i32) -> (i32, i32) {
    %c0_i32 = arith.constant 0 : i32
    %c0_i32_0 = arith.constant 0 : i32
    return %c0_i32, %arg0 : i32, i32
  }
  func.func @transform_2(%arg0: i32) -> (i32, i32) {
    %c0_i32 = arith.constant 0 : i32
    %c0_i32_0 = arith.constant 0 : i32
    %c0_i32_1 = arith.constant 0 : i32
    return %c0_i32, %c0_i32_0 : i32, i32
  }
  func.func @transform_3(%arg0: i32) -> (i32, i32) {
    %c0_i32 = arith.constant 0 : i32
    %c0_i32_0 = arith.constant 0 : i32
    %c0_i32_1 = arith.constant 0 : i32
    return %c0_i32, %c0_i32_0 : i32, i32
  }
  func.func @transform_4(%arg0: i32) -> (i32, i32) {
    %c0_i32 = arith.constant 0 : i32
    %c0_i32_0 = arith.constant 0 : i32
    %c0_i32_1 = arith.constant 0 : i32
    return %c0_i32, %c0_i32_0 : i32, i32
  }
  func.func @transform_5(%arg0: i32) -> (i32, i32) {
    %c0_i32 = arith.constant 0 : i32
    %c0_i32_0 = arith.constant 0 : i32
    %c0_i32_1 = arith.constant 0 : i32
    return %c0_i32, %c0_i32_0 : i32, i32
  }
  func.func @transform_6(%arg0: i32) -> (i32, i32) {
    %c0_i32 = arith.constant 0 : i32
    %c0_i32_0 = arith.constant 0 : i32
    %c0_i32_1 = arith.constant 0 : i32
    return %c0_i32, %c0_i32_0 : i32, i32
  }
  func.func @transform_7(%arg0: i32) -> (i32, i32) {
    %c0_i32 = arith.constant 0 : i32
    %c0_i32_0 = arith.constant 0 : i32
    %c0_i32_1 = arith.constant 0 : i32
    return %c0_i32, %c0_i32_0 : i32, i32
  }
  func.func @transform_8(%arg0: i32) -> (i32, i32) {
    %c0_i32 = arith.constant 0 : i32
    %c0_i32_0 = arith.constant 0 : i32
    %c0_i32_1 = arith.constant 0 : i32
    return %c0_i32, %c0_i32_0 : i32, i32
  }
  func.func @transform_9(%arg0: i32) -> (i32, i32) {
    %c0_i32 = arith.constant 0 : i32
    %c0_i32_0 = arith.constant 0 : i32
    %c0_i32_1 = arith.constant 0 : i32
    return %c0_i32, %c0_i32_0 : i32, i32
  }
  func.func @transform_10(%arg0: i32) -> (i32, i32) {
    %c0_i32 = arith.constant 0 : i32
    %c0_i32_0 = arith.constant 0 : i32
    return %c0_i32, %arg0 : i32, i32
  }
}

</mosaic_0001>

<bundles_post_ra>
// kernel: tpu_custom_call.1
= control target key start
LH: loop header
LB: loop body
LE: loop exit
PB: predicated region body
PF: predicated region fallthrough
CT: control target
= control target key end

     0   :  { %vm150_vm0 = vcmask 130048   ;;  %v1113_v4 = vmov 0   ;;  %s1422_s0 = inlined_call_operand.vmem [shape: f32[16,128], index: 0, kind: input, shape index: {}]   ;;  %s1423_s1 = inlined_call_operand.vmem [shape: f32[4,128], index: 1, kind: input, shape index: {}]   ;;  %s1424_s2 = inlined_call_operand.vmem [shape: f32[128,16], index: 2, kind: input, shape index: {}]   ;;  %s1425_s3 = inlined_call_operand.vmem [shape: f32[128,1], index: 3, kind: input, shape index: {}]   ;;  %s1426_s4 = inlined_call_operand.vmem [shape: f32[128,128], index: 4, kind: input, shape index: {}]   ;;  %s1427_s5 = inlined_call_operand.vmem [shape: f32[128,1], index: 5, kind: input, shape index: {}]   ;;  %s1428_s6 = inlined_call_operand.vmem [shape: f32[8,128], index: 6, kind: input, shape index: {}]   ;;  %s1429_s7 = inlined_call_operand.vmem [shape: f32[8,1], index: 7, kind: input, shape index: {}]   ;;  %s1430_s8 = inlined_call_operand.vmem [shape: f32[4,1], index: 8, kind: input, shape index: {}]   ;;  %s1431_s9 = inlined_call_operand.vmem [shape: f32[4,1], index: 9, kind: input, shape index: {}]   ;;  %s1432_s10 = inlined_call_operand.hbm [shape: f32[2,128], index: 10, kind: output, shape index: {}]  }
   0x1   :  { %v36_v0 = vld [vmem:[%s1422_s0] sm:$0xff]  ;;  %v37_v1 = vld [vmem:[%s1422_s0 + $0x8] sm:$0xff]  ;;  %1023 = vset.pattern.permute.xlu0 %v1113_v4  ;;  %1024 = vset.pattern.permute.xlu1 %v1113_v4  ;;  %v40_v7 = vld [vmem:[%s1424_s2 + $0x10] sm:$0xff] }
   0x2   :  { %v38_v2 = vld [vmem:[%s1424_s2] sm:$0xff]  ;;  %v958_v3 = vpack.c.bf16 %v37_v1, %v36_v0  ;;  %v39_v6 = vld [vmem:[%s1424_s2 + $0x8] sm:$0xff]  ;;  %v56_v9 = vld [vmem:[%s1425_s3 + $0x10] sm:$0xff] }
   0x3   :  { %843 = vmatprep.mubr.msk.f32.mxu0 %vm150_vm0, %v38_v2  ;;  %v54_v5 = vld [vmem:[%s1425_s3] sm:$0xff]  ;;  %v55_v8 = vld [vmem:[%s1425_s3 + $0x8] sm:$0xff]  ;;  %82 = vperm.xlu1 %1024, %v56_v9   ;;  %v57_v10 = vld [vmem:[%s1425_s3 + $0x18] sm:$0xff] }
   0x4   :  { %959 = vmatprep.subr.bf16.mxu0 %v958_v3  ;;  %72 = vperm.xlu0 %1023, %v54_v5   ;;  %v41_v11 = vld [vmem:[%s1424_s2 + $0x18] sm:$0xff]  ;;  %v42_v12 = vld [vmem:[%s1424_s2 + $0x20] sm:$0xff]  ;;  %v59_v14 = vld [vmem:[%s1425_s3 + $0x28] sm:$0xff] }
   0x5   :  { %961 = vmatpush3.bf16.msra.mxu0 %v958_v3  ;;  %v58_v13 = vld [vmem:[%s1425_s3 + $0x20] sm:$0xff]  ;;  %v43_v15 = vld [vmem:[%s1424_s2 + $0x28] sm:$0xff]  ;;  %v44_v16 = vld [vmem:[%s1424_s2 + $0x30] sm:$0xff] }
   0x6   :  { %v60_v17 = vld [vmem:[%s1425_s3 + $0x30] sm:$0xff]  ;;  %v61_v18 = vld [vmem:[%s1425_s3 + $0x38] sm:$0xff]  ;;  %v46_v20 = vld [vmem:[%s1424_s2 + $0x40] sm:$0xff] }
   0x7   :  { %87 = vperm.xlu1 %1024, %v57_v10   ;;  %v45_v19 = vld [vmem:[%s1424_s2 + $0x38] sm:$0xff]  ;;  %v62_v21 = vld [vmem:[%s1425_s3 + $0x40] sm:$0xff] }
   0x8   :  { %844 = vmatmul.mubr.msk.f32.vlgmr.msra.gmra.mrb[0].mxu0 %vm150_vm0, %v39_v6  ;;  %77 = vperm.xlu0 %1023, %v55_v8  }
   0x9   :  { %846 = vmatprep.mubr.msk.f32.mxu0 %vm150_vm0, %v40_v7 }
   0xb   :  { %97 = vperm.xlu1 %1024, %v59_v14  }
   0xc   :  { %847 = vmatmul.mubr.msk.f32.gmra.mrb[2].mxu0 %vm150_vm0, %v41_v11  ;;  %92 = vperm.xlu0 %1023, %v58_v13  }
   0xd   :  { %849 = vmatprep.mubr.msk.f32.mxu0 %vm150_vm0, %v42_v12 }
  0x10   :  { %850 = vmatmul.mubr.msk.f32.gmra.mrb[4].mxu0 %vm150_vm0, %v43_v15  ;;  %102 = vperm.xlu0 %1023, %v60_v17  }
  0x11   :  { %852 = vmatprep.mubr.msk.f32.mxu0 %vm150_vm0, %v44_v16 }
  0x12   :  { %15 = vsyncpa [#allocation3], 0  ;;  %107 = vperm.xlu1 %1024, %v61_v18   ;;  %v63_v22 = vld [vmem:[%s1425_s3 + $0x48] sm:$0xff]  ;;  %v48_v24 = vld [vmem:[%s1424_s2 + $0x50] sm:$0xff]  ;;  %vm1115_vm1 = vmmov 0   ;;  %vm727_vm2 = vcmask 1043456  }
  0x13   :  { %v47_v23 = vld [vmem:[%s1424_s2 + $0x48] sm:$0xff]  ;;  %v64_v25 = vld [vmem:[%s1425_s3 + $0x50] sm:$0xff]  ;;  %v65_v26 = vld [vmem:[%s1425_s3 + $0x58] sm:$0xff]  ;;  %vm739_vm3 = vcmask 1040384  }
  0x14   :  { %853 = vmatmul.mubr.msk.f32.gmra.mrb[6].mxu0 %vm150_vm0, %v45_v19  ;;  %112 = vperm.xlu0 %1023, %v62_v21   ;;  %v49_v27 = vld [vmem:[%s1424_s2 + $0x58] sm:$0xff]  ;;  %v50_v28 = vld [vmem:[%s1424_s2 + $0x60] sm:$0xff]  ;;  %v67_v30 = vld [vmem:[%s1425_s3 + $0x68] sm:$0xff] }
  0x15   :  { %855 = vmatprep.mubr.msk.f32.mxu0 %vm150_vm0, %v46_v20  ;;  %v66_v29 = vld [vmem:[%s1425_s3 + $0x60] sm:$0xff]  ;;  %v51_v31 = vld [vmem:[%s1424_s2 + $0x68] sm:$0xff]  ;;  %v52_v32 = vld [vmem:[%s1424_s2 + $0x70] sm:$0xff] }
  0x16   :  { %117 = vperm.xlu1 %1024, %v63_v22   ;;  %v68_v33 = vld [vmem:[%s1425_s3 + $0x70] sm:$0xff]  ;;  %v69_v34 = vld [vmem:[%s1425_s3 + $0x78] sm:$0xff]  ;;  %v376_v36 = vld [vmem:[%s1427_s5] sm:$0xff] }
  0x17   :  { %v53_v35 = vld [vmem:[%s1424_s2 + $0x78] sm:$0xff]  ;;  %v377_v37 = vld [vmem:[%s1427_s5 + $0x8] sm:$0xff]  ;;  %v378_v38 = vld [vmem:[%s1427_s5 + $0x10] sm:$0xff] }
  0x18   :  { %856 = vmatmul.mubr.msk.f32.gmra.mrb[8].mxu0 %vm150_vm0, %v47_v23  ;;  %122 = vperm.xlu0 %1023, %v64_v25   ;;  %v379_v39 = vld [vmem:[%s1427_s5 + $0x18] sm:$0xff]  ;;  %v380_v40 = vld [vmem:[%s1427_s5 + $0x20] sm:$0xff]  ;;  %v381_v41 = vld [vmem:[%s1427_s5 + $0x28] sm:$0xff] }
  0x19   :  { %858 = vmatprep.mubr.msk.f32.mxu0 %vm150_vm0, %v48_v24  ;;  %v382_v42 = vld [vmem:[%s1427_s5 + $0x30] sm:$0xff]  ;;  %v383_v43 = vld [vmem:[%s1427_s5 + $0x38] sm:$0xff]  ;;  %v384_v44 = vld [vmem:[%s1427_s5 + $0x40] sm:$0xff] }
  0x1a   :  { %127 = vperm.xlu1 %1024, %v65_v26   ;;  %v385_v45 = vld [vmem:[%s1427_s5 + $0x48] sm:$0xff]  ;;  %v386_v46 = vld [vmem:[%s1427_s5 + $0x50] sm:$0xff]  ;;  %v387_v47 = vld [vmem:[%s1427_s5 + $0x58] sm:$0xff] }
  0x1b   :  { %v388_v48 = vld [vmem:[%s1427_s5 + $0x60] sm:$0xff]  ;;  %v389_v49 = vld [vmem:[%s1427_s5 + $0x68] sm:$0xff]  ;;  %v390_v50 = vld [vmem:[%s1427_s5 + $0x70] sm:$0xff] }
  0x1c   :  { %859 = vmatmul.mubr.msk.f32.gmra.mrb[10].mxu0 %vm150_vm0, %v49_v27  ;;  %132 = vperm.xlu0 %1023, %v66_v29   ;;  %v391_v51 = vld [vmem:[%s1427_s5 + $0x78] sm:$0xff]  ;;  %v634_v52 = vld [vmem:[%s1429_s7] sm:$0xff] }
  0x1d   :  { %861 = vmatprep.mubr.msk.f32.mxu0 %vm150_vm0, %v50_v28  ;;  %v713_v53 = vld [vmem:[%s1430_s8] sm:$0xf] }
  0x1e   :  { %137 = vperm.xlu1 %1024, %v67_v30   ;;  %v720_v54 = vld [vmem:[%s1431_s9] sm:$0xf] }
  0x1f   :  { %v360_v55 = vld [vmem:[%s1426_s4] sm:$0xff] }
  0x20   :  { %862 = vmatmul.mubr.msk.f32.gmra.mrb[12].mxu0 %vm150_vm0, %v51_v31  ;;  %142 = vperm.xlu0 %1023, %v68_v33  }
  0x21   :  { %864 = vmatprep.mubr.msk.f32.mxu0 %vm150_vm0, %v52_v32  ;;  %899 = vmatprep.mubr.f32.mxu1 %v360_v55 }
  0x22   :  { %147 = vperm.xlu1 %1024, %v69_v34  }
  0x24   :  { %865 = vmatmul.mubr.msk.f32.gmra.mrb[14].mxu0 %vm150_vm0, %v53_v35  ;;  %394 = vperm.xlu0 %1023, %v376_v36  }
  0x26   :  { %399 = vperm.xlu1 %1024, %v377_v37  }
  0x28   :  { %404 = vperm.xlu0 %1023, %v378_v38  }
  0x2a   :  { %409 = vperm.xlu1 %1024, %v379_v39  }
  0x2c   :  { %414 = vperm.xlu0 %1023, %v380_v40  }
  0x2e   :  { %419 = vperm.xlu1 %1024, %v381_v41  }
  0x30   :  { %424 = vperm.xlu0 %1023, %v382_v42  }
  0x32   :  { %429 = vperm.xlu1 %1024, %v383_v43  }
  0x34   :  { %434 = vperm.xlu0 %1023, %v384_v44  }
  0x36   :  { %439 = vperm.xlu1 %1024, %v385_v45  }
  0x38   :  { %444 = vperm.xlu0 %1023, %v386_v46  }
  0x3a   :  { %449 = vperm.xlu1 %1024, %v387_v47  }
  0x3c   :  { %454 = vperm.xlu0 %1023, %v388_v48  }
  0x3e   :  { %459 = vperm.xlu1 %1024, %v389_v49  }
  0x40   :  { %464 = vperm.xlu0 %1023, %v390_v50  }
  0x42   :  { %469 = vperm.xlu1 %1024, %v391_v51  }
  0x44   :  { %637 = vperm.xlu0 %1023, %v634_v52  }
  0x46   :  { %716 = vperm.xlu1 %1024, %v713_v53  }
  0x48   :  { %723 = vperm.xlu0 %1023, %v720_v54  }
  0x82   :  { %v83_v56 = vpop.permute.xlu1 %82 }
  0x83   :  { %v73_v57 = vpop.permute.xlu0 %72 }
  0x86   :  { %v88_v58 = vpop.permute.xlu1 %87 }
  0x87   :  { %v78_v59 = vpop.permute.xlu0 %77 }
  0x8a   :  { %v98_v60 = vpop.permute.xlu1 %97 }
  0x8b   :  { %v93_v61 = vpop.permute.xlu0 %92 }
  0x8f   :  { %v103_v4 = vpop.permute.xlu0 %102 }
  0x91   :  { %v108_v2 = vpop.permute.xlu1 %107 }
  0x93   :  { %v113_v13 = vpop.permute.xlu0 %112 }
  0x95   :  { %v118_v11 = vpop.permute.xlu1 %117 }
  0x97   :  { %v123_v24 = vpop.permute.xlu0 %122 }
  0x99   :  { %v128_v21 = vpop.permute.xlu1 %127 }
  0x9b   :  { %v133_v37 = vpop.permute.xlu0 %132 }
  0x9d   :  { %v138_v35 = vpop.permute.xlu1 %137 }
  0x9f   :  { %v143_v49 = vpop.permute.xlu0 %142 }
  0xa1   :  { %v148_v46 = vpop.permute.xlu1 %147 }
  0xdb   :  { %v845_v62 = vpop.f32.mrb[0].mxu0 }
  0xdc   :  { %v271_v63 = vadd.f32 %v845_v62, %v78_v59  ;;  %v265_v0 = vpop.f32.mrb[1].mxu0 }
  0xdd   :  { %v266_v1 = vadd.f32 %v265_v0, %v73_v57  ;;  %v361_v0 = vld [vmem:[%s1426_s4 + $0x8] sm:$0xff] }
  0xde   :  { %1025 = vtanh.f32 %v271_v63 }
  0xdf   :  { %1027 = vtanh.f32 %v266_v1  ;;  %v848_v3 = vpop.f32.mrb[2].mxu0  ;;  %v362_v1 = vld [vmem:[%s1426_s4 + $0x10] sm:$0xff] }
  0xe0   :  { %v281_v5 = vadd.f32 %v848_v3, %v88_v58  ;;  %v275_v6 = vpop.f32.mrb[3].mxu0  ;;  %v364_v3 = vld [vmem:[%s1426_s4 + $0x20] sm:$0xff] }
  0xe1   :  { %v276_v7 = vadd.f32 %v275_v6, %v83_v56  ;;  %v367_v6 = vld [vmem:[%s1426_s4 + $0x38] sm:$0xff] }
  0xe2   :  { %1029 = vtanh.f32 %v281_v5  ;;  %v366_v5 = vld [vmem:[%s1426_s4 + $0x30] sm:$0xff] }
  0xe3   :  { %1031 = vtanh.f32 %v276_v7  ;;  %v851_v8 = vpop.f32.mrb[4].mxu0  ;;  %v368_v7 = vld [vmem:[%s1426_s4 + $0x40] sm:$0xff] }
  0xe4   :  { %v291_v9 = vadd.f32 %v851_v8, %v98_v60  ;;  %v285_v10 = vpop.f32.mrb[5].mxu0  ;;  %v369_v8 = vld [vmem:[%s1426_s4 + $0x48] sm:$0xff] }
  0xe5   :  { %v286_v12 = vadd.f32 %v285_v10, %v93_v61  ;;  %v371_v10 = vld [vmem:[%s1426_s4 + $0x58] sm:$0xff] }
  0xe6   :  { %1033 = vtanh.f32 %v291_v9  ;;  %v370_v9 = vld [vmem:[%s1426_s4 + $0x50] sm:$0xff] }
  0xe7   :  { %1035 = vtanh.f32 %v286_v12  ;;  %v854_v14 = vpop.f32.mrb[6].mxu0  ;;  %v373_v12 = vld [vmem:[%s1426_s4 + $0x68] sm:$0xff] }
  0xe8   :  { %v1026_v15 = vpop.eup %1025  ;;  %v301_v16 = vadd.f32 %v854_v14, %v108_v2  ;;  %v295_v17 = vpop.f32.mrb[7].mxu0  ;;  %v363_v2 = vld [vmem:[%s1426_s4 + $0x18] sm:$0xff] }
  0xe9   :  { %v1028_v18 = vpop.eup %1027  ;;  %v296_v19 = vadd.f32 %v295_v17, %v103_v4  ;;  %v365_v4 = vld [vmem:[%s1426_s4 + $0x28] sm:$0xff]  ;;  %v375_v14 = vld [vmem:[%s1426_s4 + $0x78] sm:$0xff]  ;;  %v400_v17 = vpop.permute.xlu1 %399 }
  0xea   :  { %1037 = vtanh.f32 %v301_v16  ;;  %v962_v20 = vpack.c.bf16 %v1026_v15, %v1028_v18  ;;  %v1114_v15 = vmov 0.0|0.0   ;;  %v1116_v16 = vmov 0.0   ;;  %v395_v18 = vpop.permute.xlu0 %394 }
  0xeb   :  { %1039 = vtanh.f32 %v296_v19  ;;  %v857_v22 = vpop.f32.mrb[8].mxu0  ;;  %994 = vmatprep.subr.bf16.mxu0 %v1114_v15  ;;  %955 = vmatprep.mubr.msk.f32.mxu0 %vm1115_vm1, %v1116_v16 }
  0xec   :  { %v1030_v23 = vpop.eup %1029  ;;  %v311_v25 = vadd.f32 %v857_v22, %v118_v11  ;;  %v305_v26 = vpop.f32.mrb[9].mxu0  ;;  %963 = vmatprep.subr.bf16.mxu1 %v962_v20  ;;  %v372_v11 = vld [vmem:[%s1426_s4 + $0x60] sm:$0xff] }
  0xed   :  { %v1032_v27 = vpop.eup %1031  ;;  %v306_v28 = vadd.f32 %v305_v26, %v113_v13  ;;  %965 = vmatpush3.bf16.msra.mxu1 %v962_v20  ;;  %v374_v13 = vld [vmem:[%s1426_s4 + $0x70] sm:$0xff]  ;;  %v410_v19 = vpop.permute.xlu1 %409 }
  0xee   :  { %1041 = vtanh.f32 %v311_v25  ;;  %v966_v29 = vpack.c.bf16 %v1030_v23, %v1032_v27  ;;  %v405_v20 = vpop.permute.xlu0 %404 }
  0xef   :  { %1043 = vtanh.f32 %v306_v28  ;;  %v860_v30 = vpop.f32.mrb[10].mxu0 }
  0xf0   :  { %v1034_v31 = vpop.eup %1033  ;;  %v321_v32 = vadd.f32 %v860_v30, %v128_v21  ;;  %v315_v33 = vpop.f32.mrb[11].mxu0  ;;  %967 = vmatprep.subr.bf16.mxu1 %v966_v29 }
  0xf1   :  { %v1036_v34 = vpop.eup %1035  ;;  %v316_v36 = vadd.f32 %v315_v33, %v123_v24  ;;  %969 = vmatpush3.bf16.msra.mxu1 %v966_v29  ;;  %v420_v21 = vpop.permute.xlu1 %419 }
  0xf2   :  { %1045 = vtanh.f32 %v321_v32  ;;  %v970_v38 = vpack.c.bf16 %v1034_v31, %v1036_v34  ;;  %v415_v22 = vpop.permute.xlu0 %414 }
  0xf3   :  { %1047 = vtanh.f32 %v316_v36  ;;  %v863_v39 = vpop.f32.mrb[12].mxu0 }
  0xf4   :  { %v1038_v40 = vpop.eup %1037  ;;  %v331_v41 = vadd.f32 %v863_v39, %v138_v35  ;;  %v325_v42 = vpop.f32.mrb[13].mxu0  ;;  %971 = vmatprep.subr.bf16.mxu1 %v970_v38 }
  0xf5   :  { %v1040_v43 = vpop.eup %1039  ;;  %v326_v44 = vadd.f32 %v325_v42, %v133_v37  ;;  %973 = vmatpush3.bf16.msra.mxu1 %v970_v38  ;;  %v430_v27 = vpop.permute.xlu1 %429 }
  0xf6   :  { %1049 = vtanh.f32 %v331_v41  ;;  %v974_v45 = vpack.c.bf16 %v1038_v40, %v1040_v43  ;;  %v425_v29 = vpop.permute.xlu0 %424 }
  0xf7   :  { %1051 = vtanh.f32 %v326_v44  ;;  %v866_v47 = vpop.f32.mrb[14].mxu0 }
  0xf8   :  { %v1042_v48 = vpop.eup %1041  ;;  %v341_v50 = vadd.f32 %v866_v47, %v148_v46  ;;  %v335_v51 = vpop.f32.mrb[15].mxu0  ;;  %975 = vmatprep.subr.bf16.mxu1 %v974_v45 }
  0xf9   :  { %v1044_v52 = vpop.eup %1043  ;;  %v336_v53 = vadd.f32 %v335_v51, %v143_v49  ;;  %977 = vmatpush3.bf16.msra.mxu1 %v974_v45  ;;  %v440_v36 = vpop.permute.xlu1 %439 }
  0xfa   :  { %1053 = vtanh.f32 %v341_v50  ;;  %v978_v54 = vpack.c.bf16 %v1042_v48, %v1044_v52  ;;  %v435_v38 = vpop.permute.xlu0 %434 }
  0xfb   :  { %1055 = vtanh.f32 %v336_v53 }
  0xfc   :  { %v1046_v55 = vpop.eup %1045  ;;  %979 = vmatprep.subr.bf16.mxu1 %v978_v54 }
  0xfd   :  { %v1048_v56 = vpop.eup %1047  ;;  %981 = vmatpush3.bf16.msra.mxu1 %v978_v54  ;;  %v450_v46 = vpop.permute.xlu1 %449 }
  0xfe   :  { %v982_v57 = vpack.c.bf16 %v1046_v55, %v1048_v56  ;;  %v445_v49 = vpop.permute.xlu0 %444 }
 0x100   :  { %v1050_v58 = vpop.eup %1049  ;;  %983 = vmatprep.subr.bf16.mxu1 %v982_v57 }
 0x101   :  { %v1052_v59 = vpop.eup %1051  ;;  %985 = vmatpush3.bf16.msra.mxu1 %v982_v57 }
 0x102   :  { %v986_v60 = vpack.c.bf16 %v1050_v58, %v1052_v59 }
 0x104   :  { %v1054_v61 = vpop.eup %1053  ;;  %987 = vmatprep.subr.bf16.mxu1 %v986_v60 }
 0x105   :  { %v1056_v62 = vpop.eup %1055  ;;  %989 = vmatpush3.bf16.msra.mxu1 %v986_v60  ;;  %v460_v60 = vpop.permute.xlu1 %459 }
 0x106   :  { %v990_v63 = vpack.c.bf16 %v1054_v61, %v1056_v62  ;;  %v455_v62 = vpop.permute.xlu0 %454 }
 0x108   :  { %991 = vmatprep.subr.bf16.mxu1 %v990_v63 }
 0x109   :  { %993 = vmatpush3.bf16.msra.mxu1 %v990_v63 }
 0x10c   :  { %900 = vmatmul.mubr.f32.vlgmr.msra.gmra.mrb[0].mxu1 %v361_v0 }
 0x10d   :  { %902 = vmatprep.mubr.f32.mxu1 %v362_v1 }
 0x110   :  { %903 = vmatmul.mubr.f32.gmra.mrb[2].mxu1 %v363_v2 }
 0x111   :  { %905 = vmatprep.mubr.f32.mxu1 %v364_v3 }
 0x114   :  { %906 = vmatmul.mubr.f32.gmra.mrb[4].mxu1 %v365_v4 }
 0x115   :  { %908 = vmatprep.mubr.f32.mxu1 %v366_v5 }
 0x118   :  { %909 = vmatmul.mubr.f32.gmra.mrb[6].mxu1 %v367_v6 }
 0x119   :  { %911 = vmatprep.mubr.f32.mxu1 %v368_v7  ;;  %v470_v7 = vpop.permute.xlu1 %469 }
 0x11c   :  { %912 = vmatmul.mubr.f32.gmra.mrb[8].mxu1 %v369_v8 }
 0x11d   :  { %914 = vmatprep.mubr.f32.mxu1 %v370_v9 }
 0x120   :  { %915 = vmatmul.mubr.f32.gmra.mrb[10].mxu1 %v371_v10  ;;  %v465_v10 = vpop.permute.xlu0 %464 }
 0x121   :  { %917 = vmatprep.mubr.f32.mxu1 %v372_v11 }
 0x124   :  { %918 = vmatmul.mubr.f32.gmra.mrb[12].mxu1 %v373_v12 }
 0x125   :  { %920 = vmatprep.mubr.f32.mxu1 %v374_v13 }
 0x128   :  { %921 = vmatmul.mubr.f32.gmra.mrb[14].mxu1 %v375_v14 }
 0x1df   :  { %v901_v23 = vpop.f32.mrb[0].mxu1 }
 0x1e0   :  { %v544_v24 = vadd.f32 %v901_v23, %v400_v17  ;;  %v538_v25 = vpop.f32.mrb[1].mxu1 }
 0x1e1   :  { %v539_v26 = vadd.f32 %v538_v25, %v395_v18 }
 0x1e2   :  { %1057 = vtanh.f32 %v544_v24 }
 0x1e3   :  { %1059 = vtanh.f32 %v539_v26  ;;  %v904_v28 = vpop.f32.mrb[2].mxu1  ;;  %v633_v26 = vld [vmem:[%s1428_s6] sm:$0xff]  ;;  %s1117_s6 = smov [#allocation2]  }
 0x1e4   :  { %v554_v30 = vadd.f32 %v904_v28, %v410_v19  ;;  %v548_v31 = vpop.f32.mrb[3].mxu1  ;;  %s748_s14 = sshll.u32 %s1117_s6, 4  ;;  %s749_s14 = int_to_ptr.vmem [resolvable:$true] %s748_s14 }
 0x1e5   :  { %v549_v32 = vadd.f32 %v548_v31, %v405_v20  ;;  %p1094_p1 = scmp.lt.s32.totalorder %s749_s14, %s749_s14 }
 0x1e6   :  { %1061 = vtanh.f32 %v554_v30 }
 0x1e7   :  { %1063 = vtanh.f32 %v549_v32  ;;  %v907_v33 = vpop.f32.mrb[4].mxu1 }
 0x1e8   :  { %v564_v34 = vadd.f32 %v907_v33, %v420_v21  ;;  %v558_v35 = vpop.f32.mrb[5].mxu1 }
 0x1e9   :  { %v559_v37 = vadd.f32 %v558_v35, %v415_v22 }
 0x1ea   :  { %1065 = vtanh.f32 %v564_v34  ;;  %v717_v34 = vpop.permute.xlu1 %716 }
 0x1eb   :  { %1067 = vtanh.f32 %v559_v37  ;;  %v910_v39 = vpop.f32.mrb[6].mxu1 }
 0x1ec   :  { %v1058_v40 = vpop.eup %1057  ;;  %v574_v41 = vadd.f32 %v910_v39, %v430_v27  ;;  %v568_v42 = vpop.f32.mrb[7].mxu1 }
 0x1ed   :  { %v1060_v43 = vpop.eup %1059  ;;  %v569_v44 = vadd.f32 %v568_v42, %v425_v29  ;;  %v638_v27 = vpop.permute.xlu0 %637  ;;  %v710_v29 = vld [vmem:[%s1423_s1] sm:$0xf]  ;;  %s1089_s1 = scalar_lea.vmem %s749_s14, 32 }
 0x1ee   :  { %1069 = vtanh.f32 %v574_v41  ;;  %v995_v45 = vpack.c.bf16 %v1058_v40, %v1060_v43  ;;  %p1090_p0 = scmp.ne.s32.totalorder %s749_s14, %s1089_s1  ;;  %p1095_p2 = scmp.lt.s32.totalorder %s1089_s1, %s1089_s1 }
 0x1ef   :  { %1071 = vtanh.f32 %v569_v44  ;;  %v913_v47 = vpop.f32.mrb[8].mxu1 }
 0x1f0   :  { %v1062_v48 = vpop.eup %1061  ;;  %v584_v50 = vadd.f32 %v913_v47, %v440_v36  ;;  %v578_v51 = vpop.f32.mrb[9].mxu1  ;;  %996 = vmatpush3.bf16.msra.mxu0 %v995_v45  ;;  %p1096_p3 = por %p1095_p2, %p1094_p1 }
 0x1f1   :  { %v1064_v52 = vpop.eup %1063  ;;  %v579_v53 = vadd.f32 %v578_v51, %v435_v38  ;;  %997 = vmatprep.subr.bf16.mxu0 %v1114_v15 }
 0x1f2   :  { %1073 = vtanh.f32 %v584_v50  ;;  %v998_v54 = vpack.c.bf16 %v1062_v48, %v1064_v52  ;;  %p1097_p4 = pnand %p1096_p3, %p1090_p0 }
 0x1f3   :  { %1075 = vtanh.f32 %v579_v53  ;;  %v916_v55 = vpop.f32.mrb[10].mxu1 }
 0x1f4   :  { %v1066_v56 = vpop.eup %1065  ;;  %v594_v57 = vadd.f32 %v916_v55, %v450_v46  ;;  %v588_v58 = vpop.f32.mrb[11].mxu1  ;;  %999 = vmatpush3.bf16.msra.mxu0 %v998_v54 }
 0x1f5   :  { %v1068_v59 = vpop.eup %1067  ;;  %v589_v61 = vadd.f32 %v588_v58, %v445_v49  ;;  %1000 = vmatprep.subr.bf16.mxu0 %v1114_v15 }
 0x1f6   :  { %1077 = vtanh.f32 %v594_v57  ;;  %v1001_v63 = vpack.c.bf16 %v1066_v56, %v1068_v59 }
 0x1f7   :  { %1079 = vtanh.f32 %v589_v61  ;;  %v919_v0 = vpop.f32.mrb[12].mxu1 }
 0x1f8   :  { %v1070_v1 = vpop.eup %1069  ;;  %v604_v2 = vadd.f32 %v919_v0, %v460_v60  ;;  %v598_v3 = vpop.f32.mrb[13].mxu1  ;;  %1002 = vmatpush3.bf16.msra.mxu0 %v1001_v63 }
 0x1f9   :  { %v1072_v4 = vpop.eup %1071  ;;  %v599_v5 = vadd.f32 %v598_v3, %v455_v62  ;;  %1003 = vmatprep.subr.bf16.mxu0 %v1114_v15 }
 0x1fa   :  { %1081 = vtanh.f32 %v604_v2  ;;  %v1004_v6 = vpack.c.bf16 %v1070_v1, %v1072_v4 }
 0x1fb   :  { %1083 = vtanh.f32 %v599_v5  ;;  %v922_v8 = vpop.f32.mrb[14].mxu1 }
 0x1fc   :  { %v1074_v9 = vpop.eup %1073  ;;  %v614_v11 = vadd.f32 %v922_v8, %v470_v7  ;;  %v608_v12 = vpop.f32.mrb[15].mxu1  ;;  %1005 = vmatpush3.bf16.msra.mxu0 %v1004_v6 }
 0x1fd   :  { %v1076_v13 = vpop.eup %1075  ;;  %v609_v14 = vadd.f32 %v608_v12, %v465_v10  ;;  %1006 = vmatprep.subr.bf16.mxu0 %v1114_v15 }
 0x1fe   :  { %1085 = vtanh.f32 %v614_v11  ;;  %v1007_v16 = vpack.c.bf16 %v1074_v9, %v1076_v13 }
 0x1ff   :  { %1087 = vtanh.f32 %v609_v14 }
 0x200   :  { %v1078_v17 = vpop.eup %1077  ;;  %1008 = vmatpush3.bf16.msra.mxu0 %v1007_v16 }
 0x201   :  { %v1080_v18 = vpop.eup %1079  ;;  %1009 = vmatprep.subr.bf16.mxu0 %v1114_v15 }
 0x202   :  { %v1010_v19 = vpack.c.bf16 %v1078_v17, %v1080_v18 }
 0x204   :  { %v1082_v20 = vpop.eup %1081  ;;  %1011 = vmatpush3.bf16.msra.mxu0 %v1010_v19 }
 0x205   :  { %v1084_v21 = vpop.eup %1083  ;;  %1012 = vmatprep.subr.bf16.mxu0 %v1114_v15 }
 0x206   :  { %v1013_v22 = vpack.c.bf16 %v1082_v20, %v1084_v21 }
 0x208   :  { %v1086_v23 = vpop.eup %1085  ;;  %1014 = vmatpush3.bf16.msra.mxu0 %v1013_v22 }
 0x209   :  { %v1088_v24 = vpop.eup %1087  ;;  %1015 = vmatprep.subr.bf16.mxu0 %v1114_v15  ;;  %v724_v15 = vpop.permute.xlu0 %723 }
 0x20a   :  { %v1016_v25 = vpack.c.bf16 %v1086_v23, %v1088_v24 }
 0x20c   :  { %1017 = vmatpush3.bf16.msra.mxu0 %v1016_v25 }
 0x20f   :  { %956 = vmatmul.mubr.f32.vlgmr.msra.gmra.mrb[16].mxu0 %v633_v26 }
 0x2e2   :  { %v706_v28 = vpop.f32.mrb[16].mxu0 }
 0x2e3   :  { %v707_v30 = vadd.f32 %v706_v28, %v638_v27  ;;  %v957_v31 = vpop.f32.mrb[17].mxu0 }
 0x2e5   :  { %v711_v32 = vsub.f32 %v710_v29, %v707_v30  ;;  %v737_v44 = vrot.slane %v707_v30, 3 }
 0x2e7   :  { %v712_v33 = vmul.f32 %v711_v32, %v711_v32 }
 0x2e9   :  { %v719_v35 = vmul.f32 %v717_v34, %v712_v33 }
 0x2eb   :  { %v726_v36 = vadd.f32 %v724_v15, %v719_v35 }
 0x2ed   :  { %v728_v37 = vsel %vm727_vm2, %v726_v36, 0.0 }
 0x2ee   :  { %v729_v38 = vrot.slane %v728_v37, 4 }
 0x2f0   :  { %v730_v39 = vadd.f32 %v729_v38, %v728_v37 }
 0x2f2   :  { %v731_v40 = vrot.slane %v730_v39, 2 }
 0x2f4   :  { %v732_v41 = vadd.f32 %v731_v40, %v730_v39 }
 0x2f6   :  { %v733_v42 = vrot.slane %v732_v41, 1 }
 0x2f8   :  { %v734_v43 = vadd.f32 %v733_v42, %v732_v41 }
 0x2fa   :  { %v735_v45 = vsub.f32 0.0, %v734_v43 }
 0x2fc   :  { %v740_v46 = vsel %vm739_vm3, %v735_v45, %v737_v44 }
 0x2fd   :  { %741 = vst [vmem:[#allocation2] sm:$0x3] %v740_v46 }
 0x2fe   :  { %1100 = shalt.err (!%p1097_p4)
}
 0x2ff   :  { %s1101_s17 = scalar_lea.hbm %s1432_s10, 32 }
 0x300   :  { %p1102_p5 = scmp.ne.s32.totalorder %s1432_s10, %s1101_s17  ;;  %p1105_p6 = scmp.lt.u32.totalorder %s1101_s17, %s1432_s10 }
 0x302   :  { %p1107_p7 = pnand %p1105_p6, %p1102_p5 }
 0x304   :  { %1110 = shalt.err (!%p1107_p7)
}
 0x305   :  { %751 = dma.vmem_to_hbm [thread:$0]  %s749_s14, 32, %s1432_s10, [#allocation3]  }
 0x306   :  { %1111 = dma.done.wait [#allocation3], 32  }
 0x307   :  { %1112 = vsyncadd [#allocation3], 4294967264 }
 0x308   :  { %755 = vsyncpa [#allocation3], 1 }

</bundles_post_ra>
